<compile_context>
chip_gen: v5e
topology: v5e:2x2
jax: 0.10.0
libtpu: 0.0.40
codegen_flags: <defaults>
</compile_context>

<pallas_src>
import functools

import jax
import jax.numpy as jnp
from jax.experimental import pallas as pl
from jax.experimental.pallas import tpu as pltpu

BN_EPS = 1e-5
LANE = 128


# ---------------------------------------------------------------------------
# Fused Pallas kernel
# ---------------------------------------------------------------------------
def _full_spec(shape):
    # grid=() -> single step; every operand is one full-array block resident in VMEM.
    return pl.BlockSpec(shape, lambda: (0,) * len(shape))


def _fused_mlp_kernel(*refs, num_hidden):
    """(Linear+foldedBN -> ReLU) x (num_hidden+1) -> Linear, all in one kernel.

    Weights are bf16 and VMEM-resident for the whole call; the activation never
    leaves VMEM/vregs between layers. Matmuls: bf16 x bf16 -> f32 accumulation
    (single MXU pass each). Bias-add / ReLU stay in f32 (VPU-friendly on v5e too).
    """
    if num_hidden > 0:
        x_ref, w0_ref, b0_ref, wh_ref, bh_ref, wo_ref, bo_ref, o_ref = refs
    else:
        x_ref, w0_ref, b0_ref, wo_ref, bo_ref = refs[:5]
        wh_ref = bh_ref = None
        o_ref = refs[5]

    h = jnp.dot(x_ref[...].astype(jnp.bfloat16), w0_ref[...],
                preferred_element_type=jnp.float32)
    h = jnp.maximum(h + b0_ref[...], 0.0)
    # Static (trace-time) unrolled loop over the stacked hidden-layer weights.
    for i in range(num_hidden):
        h = jnp.dot(h.astype(jnp.bfloat16), wh_ref[i],
                    preferred_element_type=jnp.float32)
        h = jnp.maximum(h + bh_ref[i], 0.0)
    # Head: out dim zero-padded to a multiple of 128 lanes -> dense, unmasked store.
    o_ref[...] = jnp.dot(h.astype(jnp.bfloat16), wo_ref[...],
                         preferred_element_type=jnp.float32) + bo_ref[...]


@functools.partial(jax.jit, static_argnames=("num_hidden",))
def classifier_forward(folded, x, *, num_hidden):
    """Single fused pallas_call for the whole Classifier forward (eval mode).

    Returns the lane-dense PADDED logits of shape (B, out_pad); columns
    >= out_dim are exact zeros. Slice [:, :out_dim] (or fold argmax/softmax)
    at the consumer -- doing it here would add a second tiny XLA dispatch per
    forward, comparable in cost to the whole Pallas call at these shapes.
    """
    B = x.shape[0]
    out_pad = folded["wo"].shape[1]

    if num_hidden > 0:
        operands = (x, folded["w0"], folded["b0"], folded["wh"], folded["bh"],
                    folded["wo"], folded["bo"])
    else:
        # Don't DMA never-read dummy tensors when there are no extra hidden blocks.
        operands = (x, folded["w0"], folded["b0"], folded["wo"], folded["bo"])

    # Keep at least the scoped default (16/32 MiB); grow with the real footprint;
    # cap at v7x's 64 MiB physical VMEM (layer streaming takes over past that -- see TODO).
    needed = sum(int(a.size) * a.dtype.itemsize for a in operands) + B * out_pad * 4
    vmem_limit = int(min(max(2 * needed + (4 << 20), 32 << 20), 64 << 20))

    out = pl.pallas_call(
        functools.partial(_fused_mlp_kernel, num_hidden=num_hidden),
        out_shape=jax.ShapeDtypeStruct((B, out_pad), jnp.float32),
        grid=(),
        in_specs=[_full_spec(a.shape) for a in operands],
        out_specs=_full_spec((B, out_pad)),
        compiler_params=pltpu.CompilerParams(vmem_limit_bytes=vmem_limit),
    )(*operands)
    return out


# ---------------------------------------------------------------------------
# Parameter construction, BN folding, pure-JAX references
# ---------------------------------------------------------------------------
def init_classifier_params(key, input_dim, output_dim, hidden_layers, hidden_dim):
    """Deterministic synthetic parameters matching the PyTorch module's shapes."""
    params = {"blocks": [], "head": None}
    dims = [input_dim] + [hidden_dim] * (hidden_layers + 1)
    for i in range(hidden_layers + 1):
        din, dout = dims[i], dims[i + 1]
        key, kw, kb, kg, kbeta, km, kv = jax.random.split(key, 7)
        params["blocks"].append({
            "w": jax.random.normal(kw, (din, dout), jnp.float32) * (1.0 / jnp.sqrt(din)),
            "b": jax.random.normal(kb, (1, dout), jnp.float32) * 0.01,
            "gamma": 1.0 + 0.1 * jax.random.normal(kg, (1, dout), jnp.float32),
            "beta": 0.1 * jax.random.normal(kbeta, (1, dout), jnp.float32),
            "mean": 0.05 * jax.random.normal(km, (1, dout), jnp.float32),
            "var": jnp.abs(1.0 + 0.1 * jax.random.normal(kv, (1, dout), jnp.float32)),
        })
    key, kw, kb = jax.random.split(key, 3)
    params["head"] = {
        "w": jax.random.normal(kw, (hidden_dim, output_dim), jnp.float32) * (1.0 / jnp.sqrt(hidden_dim)),
        "b": jax.random.normal(kb, (1, output_dim), jnp.float32) * 0.01,
    }
    return params


def fold_bn_and_pad(params):
    """One-time static transform:
       * fold eval-mode BN into each Linear (exact algebra, done in f32),
       * cast folded weights to bf16 (MXU operands), keep biases in f32,
       * stack the hidden-layer weights,
       * zero-pad the head to a multiple of 128 output lanes (dense store)."""
    def fold(blk):
        scale = blk["gamma"] * jax.lax.rsqrt(blk["var"] + BN_EPS)          # (1, out)
        w = (blk["w"] * scale).astype(jnp.bfloat16)                        # broadcast cols
        b = (blk["b"] - blk["mean"]) * scale + blk["beta"]                 # (1, out) f32
        return w, b

    blocks = params["blocks"]
    w0, b0 = fold(blocks[0])
    folded = {"w0": w0, "b0": b0}
    if len(blocks) > 1:
        rest = [fold(blk) for blk in blocks[1:]]
        folded["wh"] = jnp.stack([w for w, _ in rest])                     # (L, H, H) bf16
        folded["bh"] = jnp.stack([b for _, b in rest])                     # (L, 1, H) f32
    # (no dummy wh/bh when hidden_layers == 0 -- nothing useless gets DMA'd)

    wo, bo = params["head"]["w"], params["head"]["b"]
    out_dim = wo.shape[1]
    out_pad = ((out_dim + LANE - 1) // LANE) * LANE
    folded["wo"] = jnp.pad(wo, ((0, 0), (0, out_pad - out_dim))).astype(jnp.bfloat16)
    folded["bo"] = jnp.pad(bo, ((0, 0), (0, out_pad - out_dim)))           # f32
    return folded


def classifier_reference(params, x):
    """Canonical pure-JAX f32 reference: Linear -> BN(eval) -> ReLU ... -> Linear."""
    h = x
    for blk in params["blocks"]:
        y = h @ blk["w"] + blk["b"]
        y = (y - blk["mean"]) / jnp.sqrt(blk["var"] + BN_EPS) * blk["gamma"] + blk["beta"]
        h = jnp.maximum(y, 0.0)
    return h @ params["head"]["w"] + params["head"]["b"]


def folded_reference(folded, x, num_hidden):
    """Pure-JAX reference on the exact (folded bf16, padded) params the kernel sees,
    mirroring its precision regime (bf16 operands, f32 accumulation/elementwise)."""
    h = jnp.dot(x.astype(jnp.bfloat16), folded["w0"], preferred_element_type=jnp.float32)
    h = jnp.maximum(h + folded["b0"], 0.0)
    for i in range(num_hidden):
        h = jnp.dot(h.astype(jnp.bfloat16), folded["wh"][i], preferred_element_type=jnp.float32)
        h = jnp.maximum(h + folded["bh"][i], 0.0)
    return jnp.dot(h.astype(jnp.bfloat16), folded["wo"], preferred_element_type=jnp.float32) + folded["bo"]


# ---------------------------------------------------------------------------
if __name__ == "__main__":
    # Small shapes consistent with the module's forward:
    # Classifier(input_dim=64, output_dim=41, hidden_layers=2, hidden_dim=128)
    # (the real HW2 config is input_dim=2457, hidden_dim=760, hidden_layers=7 --
    #  same code path, just bigger operands).
    batch = 8
    input_dim = 64
    output_dim = 41
    hidden_layers = 2
    hidden_dim = 128

    key = jax.random.PRNGKey(0)
    key, kx = jax.random.split(key)
    x = jax.random.normal(kx, (batch, input_dim), jnp.float32)

    params = init_classifier_params(key, input_dim, output_dim, hidden_layers, hidden_dim)
    folded = fold_bn_and_pad(params)

    out_padded = classifier_forward(folded, x, num_hidden=hidden_layers)
    out_padded = jax.block_until_ready(out_padded)
    out_pad_cols = folded["wo"].shape[1]
    assert out_padded.shape == (batch, out_pad_cols), out_padded.shape

    # Padding columns must be exact zeros (zero weights, zero bias).
    assert jnp.all(out_padded[:, output_dim:] == 0.0)

    logits = out_padded[:, :output_dim]          # consumer-side slice (test only)
    assert logits.shape == (batch, output_dim), logits.shape

    # Tight check: kernel vs. pure-JAX on the identical folded/padded bf16 params
    # and the identical precision regime.
    ref_tight = folded_reference(folded, x, hidden_layers)[:, :output_dim]
    assert jnp.allclose(logits, ref_tight, atol=2e-3, rtol=2e-3), \
        float(jnp.max(jnp.abs(logits - ref_tight)))

    # Semantic check vs. the canonical f32 Linear->BN(eval)->ReLU chain. The BN fold is
    # algebraically exact; the looser tolerance absorbs the bf16 matmul-operand rounding.
    ref_canon = classifier_reference(params, x)
    assert jnp.allclose(logits, ref_canon, atol=5e-2, rtol=5e-2), \
        float(jnp.max(jnp.abs(logits - ref_canon)))

    # Also exercise the hidden_layers == 0 path (no dummy wh/bh operands are built/DMA'd).
    params0 = init_classifier_params(jax.random.PRNGKey(1), input_dim, output_dim, 0, hidden_dim)
    folded0 = fold_bn_and_pad(params0)
    out0 = jax.block_until_ready(classifier_forward(folded0, x, num_hidden=0))
    ref0 = classifier_reference(params0, x)
    assert jnp.allclose(out0[:, :output_dim], ref0, atol=5e-2, rtol=5e-2), \
        float(jnp.max(jnp.abs(out0[:, :output_dim] - ref0)))

    print("KERNEL_OK")
</pallas_src>

<mosaic_0001>
module attributes {stable_mosaic.version = 11 : i64} {
  func.func @_fused_mlp_kernel(%arg0: memref<8x64xf32, #tpu.memory_space<vmem>>, %arg1: memref<64x128xbf16, #tpu.memory_space<vmem>>, %arg2: memref<1x128xf32, #tpu.memory_space<vmem>>, %arg3: memref<2x128x128xbf16, #tpu.memory_space<vmem>>, %arg4: memref<2x1x128xf32, #tpu.memory_space<vmem>>, %arg5: memref<128x128xbf16, #tpu.memory_space<vmem>>, %arg6: memref<1x128xf32, #tpu.memory_space<vmem>>, %arg7: memref<8x128xf32, #tpu.memory_space<vmem>>) attributes {dimension_semantics = [], scalar_prefetch = 0 : i64, scratch_operands = 0 : i64, tpu.core_type = #tpu.core_type<tc>} {
    %c0 = arith.constant 0 : index
    %c0_0 = arith.constant 0 : index
    %0 = vector.load %arg0[%c0, %c0_0] : memref<8x64xf32, #tpu.memory_space<vmem>>, vector<8x64xf32>
    %1 = arith.truncf %0 : vector<8x64xf32> to vector<8x64xbf16>
    %c0_1 = arith.constant 0 : index
    %c0_2 = arith.constant 0 : index
    %2 = vector.load %arg1[%c0_1, %c0_2] : memref<64x128xbf16, #tpu.memory_space<vmem>>, vector<64x128xbf16>
    %cst = arith.constant dense<0.000000e+00> : vector<8x128xf32>
    %3 = tpu.matmul %1, %2, %cst {dimension_numbers = #tpu.dot_dimension_numbers<[1], [0], [0], [1], [0, 0, 1, 1], [], []>} : vector<8x64xbf16>, vector<64x128xbf16>, vector<8x128xf32> -> vector<8x128xf32>
    %c0_3 = arith.constant 0 : index
    %c0_4 = arith.constant 0 : index
    %4 = vector.load %arg2[%c0_3, %c0_4] : memref<1x128xf32, #tpu.memory_space<vmem>>, vector<1x128xf32>
    %5 = vector.broadcast %4 : vector<1x128xf32> to vector<8x128xf32>
    %6 = arith.addf %3, %5 : vector<8x128xf32>
    %cst_5 = arith.constant 0.000000e+00 : f32
    %7 = vector.broadcast %cst_5 : f32 to vector<8x128xf32>
    %8 = arith.maximumf %6, %7 : vector<8x128xf32>
    %9 = arith.truncf %8 : vector<8x128xf32> to vector<8x128xbf16>
    %c0_6 = arith.constant 0 : index
    %c0_7 = arith.constant 0 : index
    %c0_8 = arith.constant 0 : index
    %10 = vector.load %arg3[%c0_6, %c0_7, %c0_8] : memref<2x128x128xbf16, #tpu.memory_space<vmem>>, vector<1x128x128xbf16>
    %11 = vector.shape_cast %10 : vector<1x128x128xbf16> to vector<128x128xbf16>
    %cst_9 = arith.constant dense<0.000000e+00> : vector<8x128xf32>
    %12 = tpu.matmul %9, %11, %cst_9 {dimension_numbers = #tpu.dot_dimension_numbers<[1], [0], [0], [1], [0, 0, 1, 1], [], []>} : vector<8x128xbf16>, vector<128x128xbf16>, vector<8x128xf32> -> vector<8x128xf32>
    %c0_10 = arith.constant 0 : index
    %c0_11 = arith.constant 0 : index
    %c0_12 = arith.constant 0 : index
    %13 = vector.load %arg4[%c0_10, %c0_11, %c0_12] : memref<2x1x128xf32, #tpu.memory_space<vmem>>, vector<1x1x128xf32>
    %14 = vector.shape_cast %13 : vector<1x1x128xf32> to vector<1x128xf32>
    %15 = vector.broadcast %14 : vector<1x128xf32> to vector<8x128xf32>
    %16 = arith.addf %12, %15 : vector<8x128xf32>
    %cst_13 = arith.constant 0.000000e+00 : f32
    %17 = vector.broadcast %cst_13 : f32 to vector<8x128xf32>
    %18 = arith.maximumf %16, %17 : vector<8x128xf32>
    %19 = arith.truncf %18 : vector<8x128xf32> to vector<8x128xbf16>
    %c1 = arith.constant 1 : index
    %c0_14 = arith.constant 0 : index
    %c0_15 = arith.constant 0 : index
    %20 = vector.load %arg3[%c1, %c0_14, %c0_15] : memref<2x128x128xbf16, #tpu.memory_space<vmem>>, vector<1x128x128xbf16>
    %21 = vector.shape_cast %20 : vector<1x128x128xbf16> to vector<128x128xbf16>
    %cst_16 = arith.constant dense<0.000000e+00> : vector<8x128xf32>
    %22 = tpu.matmul %19, %21, %cst_16 {dimension_numbers = #tpu.dot_dimension_numbers<[1], [0], [0], [1], [0, 0, 1, 1], [], []>} : vector<8x128xbf16>, vector<128x128xbf16>, vector<8x128xf32> -> vector<8x128xf32>
    %c1_17 = arith.constant 1 : index
    %c0_18 = arith.constant 0 : index
    %c0_19 = arith.constant 0 : index
    %23 = vector.load %arg4[%c1_17, %c0_18, %c0_19] : memref<2x1x128xf32, #tpu.memory_space<vmem>>, vector<1x1x128xf32>
    %24 = vector.shape_cast %23 : vector<1x1x128xf32> to vector<1x128xf32>
    %25 = vector.broadcast %24 : vector<1x128xf32> to vector<8x128xf32>
    %26 = arith.addf %22, %25 : vector<8x128xf32>
    %cst_20 = arith.constant 0.000000e+00 : f32
    %27 = vector.broadcast %cst_20 : f32 to vector<8x128xf32>
    %28 = arith.maximumf %26, %27 : vector<8x128xf32>
    %29 = arith.truncf %28 : vector<8x128xf32> to vector<8x128xbf16>
    %c0_21 = arith.constant 0 : index
    %c0_22 = arith.constant 0 : index
    %30 = vector.load %arg5[%c0_21, %c0_22] : memref<128x128xbf16, #tpu.memory_space<vmem>>, vector<128x128xbf16>
    %cst_23 = arith.constant dense<0.000000e+00> : vector<8x128xf32>
    %31 = tpu.matmul %29, %30, %cst_23 {dimension_numbers = #tpu.dot_dimension_numbers<[1], [0], [0], [1], [0, 0, 1, 1], [], []>} : vector<8x128xbf16>, vector<128x128xbf16>, vector<8x128xf32> -> vector<8x128xf32>
    %c0_24 = arith.constant 0 : index
    %c0_25 = arith.constant 0 : index
    %32 = vector.load %arg6[%c0_24, %c0_25] : memref<1x128xf32, #tpu.memory_space<vmem>>, vector<1x128xf32>
    %33 = vector.broadcast %32 : vector<1x128xf32> to vector<8x128xf32>
    %34 = arith.addf %31, %33 : vector<8x128xf32>
    %c0_26 = arith.constant 0 : index
    %c0_27 = arith.constant 0 : index
    %35 = vector.load %arg7[%c0_26, %c0_27] : memref<8x128xf32, #tpu.memory_space<vmem>>, vector<8x128xf32>
    tpu.vector_store %arg7[%c0_26, %c0_27], %34 {strides = array<i32>} : memref<8x128xf32, #tpu.memory_space<vmem>>, vector<8x128xf32>,
    return
  }
}

</mosaic_0001>

<bundles_post_ra>
// kernel: classifier_forward.1
= control target key start
LH: loop header
LB: loop body
LE: loop exit
PB: predicated region body
PF: predicated region fallthrough
CT: control target
= control target key end

     0   :  { %12 = vsyncpa [#allocation3], 0  ;;  %s863_s0 = inlined_call_operand.hbm [shape: f32[8,64], index: 0, kind: input, shape index: {}]   ;;  %s864_s1 = inlined_call_operand.hbm [shape: bf16[64,128], index: 1, kind: input, shape index: {}]   ;;  %s865_s2 = inlined_call_operand.hbm [shape: f32[1,128], index: 2, kind: input, shape index: {}]   ;;  %s866_s3 = inlined_call_operand.hbm [shape: bf16[2,128,128], index: 3, kind: input, shape index: {}]   ;;  %s867_s4 = inlined_call_operand.hbm [shape: f32[2,1,128], index: 4, kind: input, shape index: {}]   ;;  %s868_s5 = inlined_call_operand.hbm [shape: bf16[128,128], index: 5, kind: input, shape index: {}]   ;;  %s869_s6 = inlined_call_operand.vmem [shape: f32[1,128], index: 6, kind: input, shape index: {}]   ;;  %s870_s7 = inlined_call_operand.hbm [shape: f32[8,128], index: 7, kind: output, shape index: {}]  }
   0x1   :  { %13 = vsyncpa [#allocation6], 0 }
   0x2   :  { %14 = vsyncpa [#allocation9], 0 }
   0x3   :  { %15 = vsyncpa [#allocation12], 0  ;;  %s32_s26 = sshll.u32 %s864_s1, 4  ;;  %s33_s26 = int_to_ptr.hbm [resolvable:$true] %s32_s26 }
   0x4   :  { %16 = vsyncpa [#allocation4], 0  ;;  %s779_s27 = smov [#allocation5]   ;;  %s56_s8 = sshll.u32 %s866_s3, 4  ;;  %s57_s8 = int_to_ptr.hbm [resolvable:$true] %s56_s8 }
   0x5   :  { %s34_s28 = sshll.u32 %s779_s27, 4  ;;  %s780_s9 = smov 64   ;;  %s35_s28 = int_to_ptr.vmem [resolvable:$true] %s34_s28 }
   0x6   :  { %s781_s10 = smov 4   ;;  %s782_s11 = smov [#allocation8]  }
   0x7   :  { %40 = dma.hbm_to_vmem [thread:$0]  %s33_s26, 512, %s35_s28, [#allocation6], %s780_s9, %s780_s9, %s781_s10  }
   0x8   :  { %s58_s12 = sshll.u32 %s782_s11, 4  ;;  %s22_s14 = sshll.u32 %s863_s0, 4  ;;  %s59_s12 = int_to_ptr.vmem [resolvable:$true] %s58_s12  ;;  %s23_s14 = int_to_ptr.hbm [resolvable:$true] %s22_s14 }
   0x9   :  { %64 = dma.hbm_to_vmem [thread:$0]  %s57_s8, 2048, %s59_s12, [#allocation9], %s780_s9, %s780_s9, %s781_s10  }
   0xa   :  { %s46_s16 = sshll.u32 %s865_s2, 4  ;;  %s783_s17 = smov [#allocation2]   ;;  %s47_s16 = int_to_ptr.hbm [resolvable:$true] %s46_s16 }
   0xb   :  { %s24_s18 = sshll.u32 %s783_s17, 4  ;;  %s784_s19 = smov [#allocation7]   ;;  %s25_s18 = int_to_ptr.vmem [resolvable:$true] %s24_s18 }
   0xc   :  { %27 = dma.hbm_to_vmem [thread:$0]  %s23_s14, 128, %s25_s18, [#allocation3]  }
   0xd   :  { %s48_s20 = sshll.u32 %s784_s19, 4  ;;  %s69_s0 = sshll.u32 %s867_s4, 4  ;;  %s49_s20 = int_to_ptr.vmem [resolvable:$true] %s48_s20  ;;  %s70_s0 = int_to_ptr.hbm [resolvable:$true] %s69_s0 }
   0xe   :  { %51 = dma.hbm_to_vmem [thread:$0]  %s47_s16, 16, %s49_s20, [#allocation6]  }
   0xf   :  { %s785_s23 = smov [#allocation10]   ;;  %s82_s2 = sshll.u32 %s868_s5, 4  ;;  %s83_s2 = int_to_ptr.hbm [resolvable:$true] %s82_s2 }
  0x10   :  { %s71_s24 = sshll.u32 %s785_s23, 4  ;;  %s786_s27 = smov 16   ;;  %s72_s24 = int_to_ptr.vmem [resolvable:$true] %s71_s24 }
  0x11   :  { %s787_s28 = smov 1   ;;  %s788_s29 = smov [#allocation11]  }
  0x12   :  { %77 = dma.hbm_to_vmem [thread:$0]  %s70_s0, 32, %s72_s24, [#allocation9], %s786_s27, %s786_s27, %s787_s28  }
  0x13   :  { %s84_s30 = sshll.u32 %s788_s29, 4  ;;  %s85_s30 = int_to_ptr.vmem [resolvable:$true] %s84_s30 }
  0x14   :  { %90 = dma.hbm_to_vmem [thread:$0]  %s83_s2, 1024, %s85_s30, [#allocation12], %s780_s9, %s780_s9, %s781_s10  }
  0x15   :  { %769 = dma.done.wait [#allocation3], 128  }
  0x16   :  { %770 = vsyncadd [#allocation3], 4294967168 }
  0x17   :  { %771 = dma.done.wait [#allocation6], 528  }
  0x18   :  { %772 = vsyncadd [#allocation6], 4294966768 }
  0x19   :  { %773 = dma.done.wait [#allocation9], 2080  }
  0x1a   :  { %774 = vsyncadd [#allocation9], 4294965216 }
  0x1b   :  { %775 = dma.done.wait [#allocation12], 1024  }
  0x1c   :  { %776 = vsyncadd [#allocation12], 4294966272  ;;  %v561_v0 = vld [vmem:[#allocation5 + $0x18] sm:$0xff]  ;;  %v560_v2 = vld [vmem:[#allocation5 + $0x10] sm:$0xff]  ;;  %vm156_vm0 = vcmask 523264   ;;  %s789_s8 = smov [#allocation13]  }
  0x1d   :  { %v569_v1 = vld [vmem:[#allocation8 + $0x38] sm:$0xff]  ;;  %164 = vmatpush.bf16.msra.mxu0 %v561_v0  ;;  %v568_v3 = vld [vmem:[#allocation8 + $0x30] sm:$0xff]  ;;  %v559_v4 = vld [vmem:[#allocation5 + $0x8] sm:$0xff]  ;;  %s430_s9 = sshll.u32 %s789_s8, 4  ;;  %s432_s12 = sshll.u32 %s870_s7, 4  ;;  %s431_s9 = int_to_ptr.vmem [resolvable:$true] %s430_s9  ;;  %s433_s12 = int_to_ptr.hbm [resolvable:$true] %s432_s12 }
  0x1e   :  { %243 = vmatpush.bf16.msra.mxu1 %v569_v1  ;;  %v567_v5 = vld [vmem:[#allocation8 + $0x28] sm:$0xff]  ;;  %v558_v6 = vld [vmem:[#allocation5] sm:$0xff]  ;;  %v118_v7 = vld [vmem:[#allocation2] sm:$0xff] }
  0x1f   :  { %v566_v8 = vld [vmem:[#allocation8 + $0x20] sm:$0xff]  ;;  %v119_v9 = vpack.c.bf16 %v118_v7, %v118_v7  ;;  %v565_v10 = vld [vmem:[#allocation8 + $0x18] sm:$0xff]  ;;  %v564_v11 = vld [vmem:[#allocation8 + $0x10] sm:$0xff] }
  0x20   :  { %v563_v12 = vld [vmem:[#allocation8 + $0x8] sm:$0xff]  ;;  %v562_v13 = vld [vmem:[#allocation8] sm:$0xff]  ;;  %v577_v14 = vld [vmem:[#allocation8 + $0x78] sm:$0xff] }
  0x21   :  { %165 = vmatpush.bf16.msra.mxu0 %v560_v2  ;;  %328 = vmatpush.bf16.msra.mxu2 %v577_v14  ;;  %v576_v15 = vld [vmem:[#allocation8 + $0x70] sm:$0xff]  ;;  %v575_v16 = vld [vmem:[#allocation8 + $0x68] sm:$0xff]  ;;  %v574_v17 = vld [vmem:[#allocation8 + $0x60] sm:$0xff] }
  0x22   :  { %244 = vmatpush.bf16.msra.mxu1 %v568_v3  ;;  %v573_v18 = vld [vmem:[#allocation8 + $0x58] sm:$0xff]  ;;  %v572_v19 = vld [vmem:[#allocation8 + $0x50] sm:$0xff]  ;;  %v571_v26 = vld [vmem:[#allocation8 + $0x48] sm:$0xff] }
  0x23   :  { %v597_v20 = vld [vmem:[#allocation7] ss:$0 sm:$0xff]  ;;  %v570_v27 = vld [vmem:[#allocation8 + $0x40] sm:$0xff]  ;;  %v584_v29 = vld [vmem:[#allocation11 + $0x30] sm:$0xff] }
  0x24   :  { %v585_v28 = vld [vmem:[#allocation11 + $0x38] sm:$0xff]  ;;  %v583_v30 = vld [vmem:[#allocation11 + $0x28] sm:$0xff]  ;;  %v582_v31 = vld [vmem:[#allocation11 + $0x20] sm:$0xff] }
  0x25   :  { %166 = vmatpush.bf16.msra.mxu0 %v559_v4  ;;  %329 = vmatpush.bf16.msra.mxu2 %v576_v15  ;;  %v581_v32 = vld [vmem:[#allocation11 + $0x18] sm:$0xff]  ;;  %v580_v33 = vld [vmem:[#allocation11 + $0x10] sm:$0xff]  ;;  %v579_v40 = vld [vmem:[#allocation11 + $0x8] sm:$0xff] }
  0x26   :  { %245 = vmatpush.bf16.msra.mxu1 %v567_v5  ;;  %411 = vmatpush.bf16.msra.mxu3 %v585_v28  ;;  %v598_v34 = vld [vmem:[#allocation10] ss:$0 sm:$0xff]  ;;  %v578_v41 = vld [vmem:[#allocation11] sm:$0xff]  ;;  %v599_v42 = vld [vmem:[#allocation10 + $0x1] ss:$0 sm:$0xff] }
  0x27   :  { %v600_v48 = vld [vmem:[%s869_s6] ss:$0 sm:$0xff] }
  0x29   :  { %167 = vmatpush.bf16.msra.mxu0 %v558_v6  ;;  %330 = vmatpush.bf16.msra.mxu2 %v575_v16 }
  0x2a   :  { %246 = vmatpush.bf16.msra.mxu1 %v566_v8  ;;  %412 = vmatpush.bf16.msra.mxu3 %v584_v29 }
  0x2c   :  { %461 = vmatmul.msk.bf16.vlgmr.msra.gmra.mxu0 %vm156_vm0, %v119_v9 }
  0x2d   :  { %331 = vmatpush.bf16.msra.mxu2 %v574_v17 }
  0x2e   :  { %247 = vmatpush.bf16.msra.mxu1 %v565_v10  ;;  %413 = vmatpush.bf16.msra.mxu3 %v583_v30 }
  0x31   :  { %332 = vmatpush.bf16.msra.mxu2 %v573_v18 }
  0x32   :  { %248 = vmatpush.bf16.msra.mxu1 %v564_v11  ;;  %414 = vmatpush.bf16.msra.mxu3 %v582_v31 }
  0x35   :  { %333 = vmatpush.bf16.msra.mxu2 %v572_v19 }
  0x36   :  { %249 = vmatpush.bf16.msra.mxu1 %v563_v12  ;;  %415 = vmatpush.bf16.msra.mxu3 %v581_v32 }
  0x39   :  { %334 = vmatpush.bf16.msra.mxu2 %v571_v26 }
  0x3a   :  { %250 = vmatpush.bf16.msra.mxu1 %v562_v13  ;;  %416 = vmatpush.bf16.msra.mxu3 %v580_v33 }
  0x3d   :  { %335 = vmatpush.bf16.msra.mxu2 %v570_v27 }
  0x3e   :  { %417 = vmatpush.bf16.msra.mxu3 %v579_v40 }
  0x42   :  { %418 = vmatpush.bf16.msra.mxu3 %v578_v41 }
  0xa9   :  { %v169_v21 = vpop.f32.mrf.mxu0 }
  0xaa   :  { %v170_v22 = vadd.f32 %v597_v20, %v169_v21 }
  0xac   :  { %v173_v23 = vmax.f32 %v170_v22, 0.0 }
  0xae   :  { %v174_v24 = vpack.c.bf16 %v173_v23, %v173_v23 }
  0xb0   :  { %251 = vmatmul.bf16.vlgmr.msra.gmra.mxu1 %v174_v24 }
  0xb1   :  { %v171_v25 = vpop.f32.mrf.mxu0 }
 0x12d   :  { %v252_v35 = vpop.f32.mrf.mxu1 }
 0x12e   :  { %v253_v36 = vadd.f32 %v598_v34, %v252_v35 }
 0x130   :  { %v256_v37 = vmax.f32 %v253_v36, 0.0 }
 0x132   :  { %v257_v38 = vpack.c.bf16 %v256_v37, %v256_v37 }
 0x134   :  { %336 = vmatmul.bf16.vlgmr.msra.gmra.mxu2 %v257_v38 }
 0x135   :  { %v254_v39 = vpop.f32.mrf.mxu1 }
 0x1b7   :  { %v337_v43 = vpop.f32.mrf.mxu2 }
 0x1b8   :  { %v338_v44 = vadd.f32 %v599_v42, %v337_v43 }
 0x1ba   :  { %v341_v45 = vmax.f32 %v338_v44, 0.0 }
 0x1bc   :  { %v342_v46 = vpack.c.bf16 %v341_v45, %v341_v45 }
 0x1be   :  { %419 = vmatmul.bf16.vlgmr.msra.gmra.mxu3 %v342_v46 }
 0x1bf   :  { %v339_v47 = vpop.f32.mrf.mxu2 }
 0x241   :  { %v420_v49 = vpop.f32.mrf.mxu3 }
 0x242   :  { %v421_v50 = vadd.f32 %v600_v48, %v420_v49 }
 0x244   :  { %424 = vst [vmem:[#allocation13] sm:$0xff] %v421_v50 }
 0x245   :  { %435 = dma.vmem_to_hbm [thread:$0]  %s431_s9, 128, %s433_s12, [#allocation4]  }
 0x249   :  { %v422_v51 = vpop.f32.mrf.mxu3 }
 0x24a   :  { %777 = dma.done.wait [#allocation4], 128  }
 0x24b   :  { %778 = vsyncadd [#allocation4], 4294967168 }
 0x24c   :  { %440 = vsyncpa [#allocation3], 1 }
 0x24d   :  { %441 = vsyncpa [#allocation6], 1 }
 0x24e   :  { %442 = vsyncpa [#allocation9], 1 }
 0x24f   :  { %443 = vsyncpa [#allocation12], 1 }
 0x250   :  { %444 = vsyncpa [#allocation4], 1 }

</bundles_post_ra>
